<compile_context>
chip_gen: v5e
topology: v5e:2x2
jax: 0.10.0
libtpu: 0.0.40
codegen_flags: <defaults>
</compile_context>

<pallas_src>
import jax
import jax.numpy as jnp
from jax import lax
from jax.experimental import pallas as pl
from jax.experimental.pallas import tpu as pltpu

_LANES = 128


def _make_kernel(total_rows, tile_rows, needs_row_mask):
    """Kernel factory: total_rows / tile_rows / needs_row_mask are trace-time constants."""

    def kernel(pred_ref, true_ref, loss_ref, cnt_ref):
        # Cast after the VMEM load so HBM traffic stays in the caller's dtype.
        pred = pred_ref[...].astype(jnp.float32)
        tru = true_ref[...].astype(jnp.float32)

        # mask = truel > 0 (zero padding is excluded automatically).
        valid = tru > 0.0
        if needs_row_mask:
            # Last grid step's block may overhang the array; mask out-of-bounds rows.
            row_ids = lax.broadcasted_iota(jnp.int32, (tile_rows, _LANES), 0)
            rows_left = total_rows - pl.program_id(0) * tile_rows
            valid = jnp.logical_and(valid, row_ids < rows_left)

        # (pred - truel) * mask  ==  pred*mask - truel*mask  for a 0/1 mask.
        diff = jnp.where(valid, pred - tru, 0.0)
        ad = jnp.abs(diff)
        # SmoothL1 (beta=1.0), branch-free: 0.5*d^2 if |d|<1 else |d|-0.5.
        q = jnp.minimum(ad, 1.0)
        elem = q * (ad - 0.5 * q)

        # Per-tile partials: sublane-only reduction to a lane vector (VPU work,
        # no full cross-lane reduce / SMEM scalar chain in the steady state).
        loss_ref[0] = jnp.sum(elem, axis=0, keepdims=True)
        cnt_ref[0] = jnp.sum(valid.astype(jnp.float32), axis=0, keepdims=True)

    return kernel


def landmarks_loss(pred, truel, alpha=1.0, *, max_tile_rows=2048):
    """Pallas TPU implementation of LandmarksLoss.forward (alpha unused in forward)."""
    assert pred.shape == truel.shape

    flat_len = int(pred.size)
    if flat_len == 0:
        return jnp.float32(0.0)

    pred_flat = jnp.ravel(pred)
    true_flat = jnp.ravel(truel)

    # Minimal lane-dense view: pad by < 128 zeros only when needed (truel padding
    # is 0 so it is excluded by the mask); ragged rows handled in-kernel.
    rows = -(-flat_len // _LANES)
    pad = rows * _LANES - flat_len
    if pad:
        pred_flat = jnp.pad(pred_flat, (0, pad))
        true_flat = jnp.pad(true_flat, (0, pad))

    pred2d = pred_flat.reshape(rows, _LANES)
    true2d = true_flat.reshape(rows, _LANES)

    if rows <= max_tile_rows:
        tile_rows = rows                      # single block: full-dim block is legal
    else:
        tile_rows = max(8, (max_tile_rows // 8) * 8)
    num_tiles = -(-rows // tile_rows)
    needs_row_mask = (rows % tile_rows) != 0

    kernel = _make_kernel(rows, tile_rows, needs_row_mask)

    part_shape = jax.ShapeDtypeStruct((num_tiles, 1, _LANES), jnp.float32)
    bytes_accessed = (
        rows * _LANES * (pred2d.dtype.itemsize + true2d.dtype.itemsize)
        + 2 * num_tiles * _LANES * 4
    )
    cost = pl.CostEstimate(
        flops=9 * rows * _LANES, transcendentals=0, bytes_accessed=bytes_accessed
    )

    loss_parts, cnt_parts = pl.pallas_call(
        kernel,
        out_shape=(part_shape, part_shape),
        grid=(num_tiles,),
        in_specs=[
            pl.BlockSpec((tile_rows, _LANES), lambda i: (i, 0)),
            pl.BlockSpec((tile_rows, _LANES), lambda i: (i, 0)),
        ],
        out_specs=(
            pl.BlockSpec((1, 1, _LANES), lambda i: (i, 0, 0)),
            pl.BlockSpec((1, 1, _LANES), lambda i: (i, 0, 0)),
        ),
        compiler_params=pltpu.CompilerParams(
            # Independent per-tile partials -> parallel axis (uses both TCs on v7x).
            dimension_semantics=("parallel",),
            vmem_limit_bytes=32 * 1024 * 1024,
            # Let XLA fuse the (tiny) pad/reshape producers into the operands so the
            # repack never materializes as an extra HBM pass.
            allow_input_fusion=[True, True],
        ),
        cost_estimate=cost,
    )(pred2d, true2d)

    loss_sum = jnp.sum(loss_parts)
    mask_sum = jnp.sum(cnt_parts)
    # TODO(synk): if callers hit very small N in a hot loop, fold the final
    # sum/divide back into a single-tile kernel variant to avoid the extra XLA op.
    return loss_sum / (mask_sum + 1e-13)


def _reference(pred, truel):
    mask = (truel > 0).astype(jnp.float32)
    p = pred.astype(jnp.float32)
    t = truel.astype(jnp.float32)
    diff = p * mask - t * mask
    ad = jnp.abs(diff)
    elem = jnp.where(ad < 1.0, 0.5 * diff * diff, ad - 0.5)
    return jnp.sum(elem) / (jnp.sum(mask) + 1e-13)


if __name__ == "__main__":
    key = jax.random.PRNGKey(0)
    k1, k2, k3, k4 = jax.random.split(key, 4)

    # Small landmark-style shape: 64 anchors, 10 landmark coords each
    # (640 elements -> exactly 5 lane-dense rows, no pad, single block).
    N, L = 64, 10
    pred = jax.random.normal(k1, (N, L), dtype=jnp.float32)
    truel = jax.random.normal(k2, (N, L), dtype=jnp.float32)
    loss = jax.block_until_ready(landmarks_loss(pred, truel))
    ref = _reference(pred, truel)
    assert jnp.allclose(loss, ref, atol=1e-5, rtol=1e-5), (loss, ref)

    # Larger shape: exercises the <128-element tail pad, multi-tile parallel grid,
    # and the in-kernel ragged-row mask (235 rows, tile 64 -> 4 tiles).
    N2, L2 = 3000, 10
    pred2 = jax.random.normal(k3, (N2, L2), dtype=jnp.float32)
    truel2 = jax.random.normal(k4, (N2, L2), dtype=jnp.float32)
    loss2 = jax.block_until_ready(landmarks_loss(pred2, truel2, max_tile_rows=64))
    ref2 = _reference(pred2, truel2)
    assert jnp.allclose(loss2, ref2, atol=1e-4, rtol=1e-4), (loss2, ref2)

    # Same data with the default (large) tile: single full-dim block path.
    loss3 = jax.block_until_ready(landmarks_loss(pred2, truel2))
    assert jnp.allclose(loss3, ref2, atol=1e-4, rtol=1e-4), (loss3, ref2)

    print("KERNEL_OK")
</pallas_src>

<mosaic_0001>
module attributes {stable_mosaic.version = 11 : i64} {
  func.func @kernel(%arg0: i32, %arg1: memref<5x128xf32, #tpu.memory_space<vmem>>, %arg2: memref<5x128xf32, #tpu.memory_space<vmem>>, %arg3: memref<1x1x128xf32, #tpu.memory_space<vmem>>, %arg4: memref<1x1x128xf32, #tpu.memory_space<vmem>>) attributes {dimension_semantics = [#tpu.dimension_semantics<parallel>], iteration_bounds = array<i64: 1>, scalar_prefetch = 0 : i64, scratch_operands = 0 : i64, tpu.core_type = #tpu.core_type<tc>, window_params = [{transform_indices = @transform_0, window_bounds = array<i64: 5, 128>}, {transform_indices = @transform_1, window_bounds = array<i64: 5, 128>}, {transform_indices = @transform_2, window_bounds = array<i64: 1, 1, 128>}, {transform_indices = @transform_3, window_bounds = array<i64: 1, 1, 128>}]} {
    %c0 = arith.constant 0 : index
    %c0_0 = arith.constant 0 : index
    %0 = vector.load %arg1[%c0, %c0_0] : memref<5x128xf32, #tpu.memory_space<vmem>>, vector<5x128xf32>
    %c0_1 = arith.constant 0 : index
    %c0_2 = arith.constant 0 : index
    %1 = vector.load %arg2[%c0_1, %c0_2] : memref<5x128xf32, #tpu.memory_space<vmem>>, vector<5x128xf32>
    %cst = arith.constant 0.000000e+00 : f32
    %2 = vector.broadcast %cst : f32 to vector<5x128xf32>
    %3 = arith.cmpf ogt, %1, %2 : vector<5x128xf32>
    %4 = arith.subf %0, %1 : vector<5x128xf32>
    %cst_3 = arith.constant 0.000000e+00 : f32
    %5 = vector.broadcast %cst_3 : f32 to vector<5x128xf32>
    %6 = arith.select %3, %4, %5 : vector<5x128xi1>, vector<5x128xf32>
    %7 = math.absf %6 : vector<5x128xf32>
    %cst_4 = arith.constant 1.000000e+00 : f32
    %8 = vector.broadcast %cst_4 : f32 to vector<5x128xf32>
    %9 = arith.minimumf %7, %8 : vector<5x128xf32>
    %cst_5 = arith.constant 5.000000e-01 : f32
    %10 = vector.broadcast %cst_5 : f32 to vector<5x128xf32>
    %11 = arith.mulf %10, %9 : vector<5x128xf32>
    %12 = arith.subf %7, %11 : vector<5x128xf32>
    %13 = arith.mulf %9, %12 : vector<5x128xf32>
    %cst_6 = arith.constant dense<0.000000e+00> : vector<128xf32>
    %14 = vector.multi_reduction <add>, %13, %cst_6 [0] : vector<5x128xf32> to vector<128xf32>
    %15 = vector.shape_cast %14 : vector<128xf32> to vector<1x128xf32>
    %c0_7 = arith.constant 0 : index
    %c0_8 = arith.constant 0 : index
    %c0_9 = arith.constant 0 : index
    %16 = vector.load %arg3[%c0_7, %c0_8, %c0_9] : memref<1x1x128xf32, #tpu.memory_space<vmem>>, vector<1x1x128xf32>
    %17 = vector.shape_cast %16 : vector<1x1x128xf32> to vector<1x128xf32>
    %18 = vector.shape_cast %15 : vector<1x128xf32> to vector<1x1x128xf32>
    tpu.vector_store %arg3[%c0_7, %c0_8, %c0_9], %18 {strides = array<i32>} : memref<1x1x128xf32, #tpu.memory_space<vmem>>, vector<1x1x128xf32>,
    %19 = arith.extui %3 : vector<5x128xi1> to vector<5x128xi32>
    %20 = arith.sitofp %19 : vector<5x128xi32> to vector<5x128xf32>
    %cst_10 = arith.constant dense<0.000000e+00> : vector<128xf32>
    %21 = vector.multi_reduction <add>, %20, %cst_10 [0] : vector<5x128xf32> to vector<128xf32>
    %22 = vector.shape_cast %21 : vector<128xf32> to vector<1x128xf32>
    %c0_11 = arith.constant 0 : index
    %c0_12 = arith.constant 0 : index
    %c0_13 = arith.constant 0 : index
    %23 = vector.load %arg4[%c0_11, %c0_12, %c0_13] : memref<1x1x128xf32, #tpu.memory_space<vmem>>, vector<1x1x128xf32>
    %24 = vector.shape_cast %23 : vector<1x1x128xf32> to vector<1x128xf32>
    %25 = vector.shape_cast %22 : vector<1x128xf32> to vector<1x1x128xf32>
    tpu.vector_store %arg4[%c0_11, %c0_12, %c0_13], %25 {strides = array<i32>} : memref<1x1x128xf32, #tpu.memory_space<vmem>>, vector<1x1x128xf32>,
    return
  }
  func.func @transform_0(%arg0: i32) -> (i32, i32) {
    %c0_i32 = arith.constant 0 : i32
    %c0_i32_0 = arith.constant 0 : i32
    return %arg0, %c0_i32 : i32, i32
  }
  func.func @transform_1(%arg0: i32) -> (i32, i32) {
    %c0_i32 = arith.constant 0 : i32
    %c0_i32_0 = arith.constant 0 : i32
    return %arg0, %c0_i32 : i32, i32
  }
  func.func @transform_2(%arg0: i32) -> (i32, i32, i32) {
    %c0_i32 = arith.constant 0 : i32
    %c0_i32_0 = arith.constant 0 : i32
    %c0_i32_1 = arith.constant 0 : i32
    return %arg0, %c0_i32, %c0_i32_0 : i32, i32, i32
  }
  func.func @transform_3(%arg0: i32) -> (i32, i32, i32) {
    %c0_i32 = arith.constant 0 : i32
    %c0_i32_0 = arith.constant 0 : i32
    %c0_i32_1 = arith.constant 0 : i32
    return %arg0, %c0_i32, %c0_i32_0 : i32, i32, i32
  }
}

</mosaic_0001>

<bundles_post_ra>
// kernel: tpu_custom_call.1
= control target key start
LH: loop header
LB: loop body
LE: loop exit
PB: predicated region body
PF: predicated region fallthrough
CT: control target
= control target key end

     0   :  { %9 = vsyncpa [#allocation3], 0  ;;  %s255_s0 = inlined_call_operand.hbm [shape: f32[5,128], index: 0, kind: input, shape index: {}]   ;;  %s256_s1 = inlined_call_operand.hbm [shape: f32[5,128], index: 1, kind: input, shape index: {}]   ;;  %s257_s2 = inlined_call_operand.hbm [shape: f32[1,1,128], index: 2, kind: output, shape index: {0}]   ;;  %s258_s3 = inlined_call_operand.hbm [shape: f32[1,1,128], index: 3, kind: output, shape index: {1}]  }
   0x1   :  { %10 = vsyncpa [#allocation6], 0 }
   0x2   :  { %11 = vsyncpa [#allocation4], 0 }
   0x3   :  { %12 = vsyncpa [#allocation9], 0  ;;  %s18_s14 = sshll.u32 %s255_s0, 4  ;;  %s216_s15 = smov [#allocation2]   ;;  %s19_s14 = int_to_ptr.hbm [resolvable:$true] %s18_s14 }
   0x4   :  { %s20_s16 = sshll.u32 %s216_s15, 4  ;;  %s29_s19 = sshll.u32 %s256_s1, 4  ;;  %s21_s16 = int_to_ptr.vmem [resolvable:$true] %s20_s16  ;;  %s30_s19 = int_to_ptr.hbm [resolvable:$true] %s29_s19 }
   0x5   :  { %23 = dma.hbm_to_vmem [thread:$0]  %s19_s14, 128, %s21_s16, [#allocation3]  }
   0x6   :  { %s217_s20 = smov [#allocation5]  }
   0x7   :  { %s31_s21 = sshll.u32 %s217_s20, 4  ;;  %s32_s21 = int_to_ptr.vmem [resolvable:$true] %s31_s21 }
   0x8   :  { %34 = dma.hbm_to_vmem [thread:$0]  %s30_s19, 128, %s32_s21, [#allocation6]  }
   0x9   :  { %208 = dma.done.wait [#allocation3], 128  }
   0xa   :  { %209 = vsyncadd [#allocation3], 4294967168 }
   0xb   :  { %210 = dma.done.wait [#allocation6], 128  }
   0xc   :  { %211 = vsyncadd [#allocation6], 4294967168  ;;  %v43_v0 = vld [vmem:[#allocation2] sm:$0x1f]  ;;  %v44_v1 = vld [vmem:[#allocation5] sm:$0x1f] }
   0xd   :  { %vm53_vm0 = vcmask 1044480   ;;  %vm45_vm1 = vcmp.gt.f32.partialorder %v44_v1, 0.0  ;;  %v46_v2 = vsub.f32 %v43_v0, %v44_v1  ;;  %v218_v3 = vmov 0.0   ;;  %s219_s0 = smov [#allocation8]   ;;  %s90_s24 = sshll.u32 %s258_s3, 4  ;;  %s91_s24 = int_to_ptr.hbm [resolvable:$true] %s90_s24 }
   0xe   :  { %v106_v4 = vsel %vm45_vm1, 1.0, %v218_v3  ;;  %s88_s1 = sshll.u32 %s219_s0, 4  ;;  %s220_s25 = smov [#allocation7]   ;;  %s89_s1 = int_to_ptr.vmem [resolvable:$true] %s88_s1 }
   0xf   :  { %v47_v5 = vsel %vm45_vm1, %v46_v2, 0.0  ;;  %v64_v6 = vsel %vm53_vm0, %v106_v4, 0.0  ;;  %s77_s26 = sshll.u32 %s220_s25, 4  ;;  %s79_s29 = sshll.u32 %s257_s2, 4  ;;  %s78_s26 = int_to_ptr.vmem [resolvable:$true] %s77_s26  ;;  %s80_s29 = int_to_ptr.hbm [resolvable:$true] %s79_s29 }
  0x10   :  { %v48_v7 = vand.u32 2147483647, %v47_v5  ;;  %v65_v8 = vrot.slane %v64_v6, 4 }
  0x12   :  { %v49_v9 = vmin.f32 %v48_v7, 1.0  ;;  %v66_v10 = vadd.f32 %v65_v8, %v64_v6 }
  0x14   :  { %v50_v11 = vmul.f32 0.5, %v49_v9  ;;  %v67_v12 = vrot.slane %v66_v10, 2 }
  0x16   :  { %v51_v13 = vsub.f32 %v48_v7, %v50_v11  ;;  %v68_v14 = vadd.f32 %v67_v12, %v66_v10 }
  0x18   :  { %v52_v15 = vmul.f32 %v51_v13, %v49_v9  ;;  %v69_v16 = vrot.slane %v68_v14, 1 }
  0x1a   :  { %v54_v17 = vsel %vm53_vm0, %v52_v15, 0.0  ;;  %v70_v18 = vadd.f32 %v69_v16, %v68_v14 }
  0x1b   :  { %v55_v19 = vrot.slane %v54_v17, 4 }
  0x1c   :  { %71 = vst [vmem:[#allocation8] sm:$0x1] %v70_v18 }
  0x1d   :  { %v56_v20 = vadd.f32 %v55_v19, %v54_v17  ;;  %93 = dma.vmem_to_hbm [thread:$0]  %s89_s1, 16, %s91_s24, [#allocation9]  }
  0x1f   :  { %v57_v21 = vrot.slane %v56_v20, 2 }
  0x21   :  { %v58_v22 = vadd.f32 %v57_v21, %v56_v20 }
  0x23   :  { %v59_v23 = vrot.slane %v58_v22, 1 }
  0x25   :  { %v60_v24 = vadd.f32 %v59_v23, %v58_v22 }
  0x27   :  { %61 = vst [vmem:[#allocation7] sm:$0x1] %v60_v24 }
  0x28   :  { %82 = dma.vmem_to_hbm [thread:$0]  %s78_s26, 16, %s80_s29, [#allocation4]  }
  0x29   :  { %212 = dma.done.wait [#allocation4], 16  }
  0x2a   :  { %213 = vsyncadd [#allocation4], 4294967280 }
  0x2b   :  { %214 = dma.done.wait [#allocation9], 16  }
  0x2c   :  { %215 = vsyncadd [#allocation9], 4294967280 }
  0x2d   :  { %102 = vsyncpa [#allocation3], 1 }
  0x2e   :  { %103 = vsyncpa [#allocation6], 1 }
  0x2f   :  { %104 = vsyncpa [#allocation4], 1 }
  0x30   :  { %105 = vsyncpa [#allocation9], 1 }

</bundles_post_ra>
